<compile_context>
chip_gen: v5e
topology: v5e:2x2
jax: 0.10.0
libtpu: 0.0.40
codegen_flags: <defaults>
</compile_context>

<pallas_src>
import math

import jax
import jax.numpy as jnp
import numpy as np
from jax.experimental import pallas as pl
from jax.experimental.pallas import tpu as pltpu

ALPHA = 0.1      # gcn2 default 'alpha'
THETA = 0.5      # gcn2 default 'theta'
BN_EPS = 1e-5    # torch.nn.BatchNorm1d default eps
LANE = 128


def _round_up(v, m):
    return (v + m - 1) // m * m


def _bn_train(h, gamma, beta):
    """BatchNorm1d in training mode: biased batch stats over the node axis."""
    mu = jnp.mean(h, axis=0, keepdims=True)
    var = jnp.mean(h * h, axis=0, keepdims=True) - mu * mu
    scale = gamma * jax.lax.rsqrt(var + BN_EPS)
    return h * scale + (beta - mu * scale)


# --------------------------------------------------------------------------- #
# Stage 1: lin_in -> BN -> ReLU (tiny separate single-block kernel)
# --------------------------------------------------------------------------- #
def lin_in_kernel(x_ref, w_ref, b_ref, g_ref, be_ref, h0_ref):
    h = jnp.dot(x_ref[...], w_ref[...],
                preferred_element_type=jnp.float32) + b_ref[...]
    h = _bn_train(h, g_ref[...], be_ref[...])
    h0_ref[...] = jnp.maximum(h, 0.0).astype(jnp.bfloat16)   # dropout(p=0) = id


# --------------------------------------------------------------------------- #
# Stage 2: GNN sandwich body (grid = (nlayer, row_tile), A resident in VMEM)
# --------------------------------------------------------------------------- #
def gnn_kernel(h0_ref, a_ref, w_eff_ref, g_ref, be_ref, w_out_ref, b_out_ref,
               o_ref,
               h_ref, hn_ref, sum_ref, sq_ref):
    l = pl.program_id(0)              # conv layer (outer, sequential)
    i = pl.program_id(1)              # node row tile (sequential: global BN + resident h)
    nl = pl.num_programs(0)
    ni = pl.num_programs(1)
    tm = o_ref.shape[0]
    n_nodes = h_ref.shape[0]

    # ---- seed resident node state once (x0 is simply the resident h0 block) --
    @pl.when((l == 0) & (i == 0))
    def _seed():
        h_ref[...] = h0_ref[...]

    @pl.when(i == 0)
    def _init_stats():
        sum_ref[...] = jnp.zeros_like(sum_ref)
        sq_ref[...] = jnp.zeros_like(sq_ref)

    # ---- conv layer l, row tile i: (1-a)*A@h + a*x0, then @ W_eff[l] ---------
    row = pl.multiple_of(i * tm, tm)
    a_slab = a_ref[pl.ds(row, tm), :]                         # (tm, N) bf16, resident
    prop = jnp.dot(a_slab, h_ref[...], preferred_element_type=jnp.float32)
    x0_blk = h0_ref[pl.ds(row, tm), :].astype(jnp.float32)    # initial residual
    mix = (1.0 - ALPHA) * prop + ALPHA * x0_blk
    # (1-b_l)*h + b_l*(h @ W_l) folded into W_eff on the host.
    out = jnp.dot(mix.astype(jnp.bfloat16), w_eff_ref[0],
                  preferred_element_type=jnp.float32)

    @pl.when(l < nl - 1)
    def _stash():
        ob = out.astype(jnp.bfloat16)          # bf16 pre-BN scratch (halves buffer)
        hn_ref[pl.ds(row, tm), :] = ob
        of = ob.astype(jnp.float32)
        sum_ref[...] += jnp.sum(of, axis=0, keepdims=True)
        sq_ref[...] += jnp.sum(of * of, axis=0, keepdims=True)
        # Row-tiled output block also writes back on earlier layers; emit
        # deterministic zeros (the last layer overwrites every row later).
        o_ref[...] = jnp.zeros(o_ref.shape, o_ref.dtype)

    @pl.when(l == nl - 1)
    def _emit():                               # lin_out, lane-dense (tm, CP) store
        o_ref[...] = (jnp.dot(out.astype(jnp.bfloat16), w_out_ref[...],
                              preferred_element_type=jnp.float32)
                      + b_out_ref[...])

    # ---- layer epilogue: GLOBAL BatchNorm (all-node batch stats) + ReLU -------
    @pl.when((i == ni - 1) & (l < nl - 1))
    def _epilogue():
        inv_n = 1.0 / float(n_nodes)
        mu = sum_ref[...] * inv_n
        var = sq_ref[...] * inv_n - mu * mu
        scale = g_ref[0] * jax.lax.rsqrt(var + BN_EPS)
        shift = be_ref[0] - mu * scale
        h_ref[...] = jnp.maximum(
            hn_ref[...].astype(jnp.float32) * scale + shift, 0.0
        ).astype(jnp.bfloat16)


# --------------------------------------------------------------------------- #
# Host-side preparation / wrapper
# --------------------------------------------------------------------------- #
def prepare_inputs(x, a_hat, params, nlayer, nhidden, nclass):
    """Pad to lane-dense (128) feature dims, cast matmul operands to bf16, fold
    the per-layer GCNII mixing scalar into an effective weight."""
    nfeat = x.shape[1]
    hp = _round_up(nhidden, LANE)
    cp = _round_up(nclass, LANE)

    def pad2(a, rows, cols):
        return jnp.pad(a, ((0, rows - a.shape[0]), (0, cols - a.shape[1])))

    eye = jnp.eye(nhidden, dtype=jnp.float32)
    betas = [math.log(THETA / (l + 1) + 1.0) for l in range(nlayer)]
    w_eff = jnp.stack([(1.0 - b) * eye + b * params["w_conv"][l]
                       for l, b in enumerate(betas)])
    w_eff = jnp.pad(w_eff, ((0, 0), (0, hp - nhidden), (0, hp - nhidden)))

    gamma = pad2(params["gamma"], nlayer, hp).astype(jnp.float32)
    beta = pad2(params["beta"], nlayer, hp).astype(jnp.float32)

    return dict(
        x=x.astype(jnp.bfloat16),                       # bf16 on the host
        a=a_hat.astype(jnp.bfloat16),
        w_in=pad2(params["w_in"], nfeat, hp).astype(jnp.bfloat16),
        b_in=pad2(params["b_in"], 1, hp).astype(jnp.float32),
        # norms[-1] (row nlayer-1) is the BatchNorm appended for lin_in.
        g_in=gamma[nlayer - 1:nlayer],
        be_in=beta[nlayer - 1:nlayer],
        w_eff=w_eff.astype(jnp.bfloat16),
        g=gamma[:, None, :],            # (nlayer, 1, HP): per-layer (1,1,HP) blocks
        be=beta[:, None, :],
        w_out=pad2(params["w_out"], hp, cp).astype(jnp.bfloat16),
        b_out=pad2(params["b_out"], 1, cp).astype(jnp.float32),
        hp=hp, cp=cp)


def _pick_tile(n):
    for t in (1024, 512, 256, 128):
        if n % t == 0:
            return t
    return n   # single tile: block equals the full dim


def _pick_vmem_limit_bytes():
    # Explicit, generation-aware scoped-VMEM limit (defaults are 16/32 MiB while
    # physical VMEM is 128 MiB on v5e/v6e and 64 MiB on v7x). ~25% headroom.
    cap = None
    try:
        cap = getattr(pltpu.get_tpu_info(), "vmem_capacity_bytes", None)
    except Exception:
        cap = None
    if not cap:
        cap = 64 * 1024 * 1024
    return int(min(max(cap * 3 // 4, 32 * 1024 * 1024), 100 * 1024 * 1024))


def _spec(shape, index_map, nbuf=None):
    """BlockSpec helper: single-buffer grid-invariant blocks when supported."""
    if nbuf is not None:
        try:
            return pl.BlockSpec(shape, index_map, pipeline_mode=pl.Buffered(nbuf))
        except (TypeError, AttributeError):
            pass
    return pl.BlockSpec(shape, index_map)


def sandwitch_thr_forward(x, a_hat, params, nlayer, nhidden, nclass, *, tm=None):
    n, nfeat = x.shape
    prep = prepare_inputs(x, a_hat, params, nlayer, nhidden, nclass)
    hp, cp = prep["hp"], prep["cp"]
    tm = tm or _pick_tile(n)
    assert n % tm == 0 and n % 8 == 0, "pad N to a multiple of the tile size"
    ni = n // tm

    vmem_limit = _pick_vmem_limit_bytes()
    resident_bytes = (n * n * 2                  # A_hat (bf16, single buffer)
                      + 3 * n * hp * 2           # h0 input + h + h_next scratch (bf16)
                      + 2 * tm * cp * 4          # double-buffered output tile
                      + 3 * hp * hp * 2          # W_eff (x2 buf) + w_out
                      + (1 << 20))               # slack for small blocks
    # TODO(synk): fall back to streamed / quantized / block-sparse A when this fails.
    assert resident_bytes <= vmem_limit, (
        f"A_hat ({n}x{n} bf16) + node state does not fit the VMEM budget "
        f"({resident_bytes} > {vmem_limit} bytes); streamed-A fallback not implemented")

    # ---- Stage 1: lin_in + BN + ReLU (single-block kernel) --------------------
    h0 = pl.pallas_call(
        lin_in_kernel,
        out_shape=jax.ShapeDtypeStruct((n, hp), jnp.bfloat16),
    )(prep["x"], prep["w_in"], prep["b_in"], prep["g_in"], prep["be_in"])

    # ---- Stage 2: GNN sandwich -------------------------------------------------
    flops = nlayer * (2 * n * n * hp + 2 * n * hp * hp) + 2 * n * hp * cp
    bytes_accessed = (n * n * 2 + n * hp * 2
                      + nlayer * hp * hp * 2 + hp * cp * 2
                      + nlayer * n * cp * 4)
    cost = pl.CostEstimate(flops=flops, transcendentals=nlayer * hp,
                           bytes_accessed=bytes_accessed)

    const2 = lambda l, i: (0, 0)
    per_layer3 = lambda l, i: (l, 0, 0)

    out_padded = pl.pallas_call(
        gnn_kernel,
        out_shape=jax.ShapeDtypeStruct((n, cp), jnp.float32),
        grid_spec=pltpu.PrefetchScalarGridSpec(
            num_scalar_prefetch=0,
            grid=(nlayer, ni),
            in_specs=[
                _spec((n, hp), const2, nbuf=1),       # h0 (resident; also the x0 residual)
                _spec((n, n), const2, nbuf=1),        # A_hat: fetched ONCE, VMEM-resident
                _spec((1, hp, hp), per_layer3),       # W_eff[l]
                _spec((1, 1, hp), per_layer3),        # gamma[l]
                _spec((1, 1, hp), per_layer3),        # beta[l]
                _spec((hp, cp), const2, nbuf=1),      # w_out
                _spec((1, cp), const2, nbuf=1),       # b_out
            ],
            out_specs=pl.BlockSpec((tm, cp), lambda l, i: (i, 0)),   # row-tiled, lane-dense
            scratch_shapes=[
                pltpu.VMEM((n, hp), jnp.bfloat16),    # h      (current layer input)
                pltpu.VMEM((n, hp), jnp.bfloat16),    # h_next (pre-BN, bf16)
                pltpu.VMEM((1, hp), jnp.float32),     # BN column sums
                pltpu.VMEM((1, hp), jnp.float32),     # BN column sums of squares
            ],
        ),
        compiler_params=pltpu.CompilerParams(
            # Both axes carry cross-step state (resident h/h_next, global BN
            # statistics), so they must stay sequential ("arbitrary").
            dimension_semantics=("arbitrary", "arbitrary"),
            vmem_limit_bytes=vmem_limit,
        ),
        cost_estimate=cost,
    )(h0, prep["a"], prep["w_eff"], prep["g"], prep["be"], prep["w_out"],
      prep["b_out"])
    return out_padded[:, :nclass]


# --------------------------------------------------------------------------- #
# Pure-JAX reference (same padding / bf16 rounding as the kernels)
# --------------------------------------------------------------------------- #
def reference_forward(prep, nlayer, nclass):
    h0 = (jnp.dot(prep["x"], prep["w_in"], preferred_element_type=jnp.float32)
          + prep["b_in"])
    h0 = _bn_train(h0, prep["g_in"], prep["be_in"])
    h0 = jnp.maximum(h0, 0.0).astype(jnp.bfloat16)
    h = h0
    last = None
    for l in range(nlayer):
        prop = jnp.dot(prep["a"], h, preferred_element_type=jnp.float32)
        mix = (1.0 - ALPHA) * prop + ALPHA * h0.astype(jnp.float32)
        out = jnp.dot(mix.astype(jnp.bfloat16), prep["w_eff"][l],
                      preferred_element_type=jnp.float32)
        if l < nlayer - 1:
            ob = out.astype(jnp.bfloat16).astype(jnp.float32)  # kernel stores h_next in bf16
            ob = _bn_train(ob, prep["g"][l], prep["be"][l])
            h = jnp.maximum(ob, 0.0).astype(jnp.bfloat16)
        else:
            last = out
    o = (jnp.dot(last.astype(jnp.bfloat16), prep["w_out"],
                 preferred_element_type=jnp.float32) + prep["b_out"])
    return o[:, :nclass]


if __name__ == "__main__":
    N, nfeat, nhidden, nclass, nlayer = 256, 64, 32, 8, 3
    n_edges = 1024

    key = jax.random.PRNGKey(0)
    ks = jax.random.split(key, 10)

    # Node features + random graph (PyTorch-style [2, E] edge index)
    x = jax.random.normal(ks[0], (N, nfeat), dtype=jnp.float32)
    src = jax.random.randint(ks[1], (n_edges,), 0, N)
    dst = jax.random.randint(ks[2], (n_edges,), 0, N)
    edge_idx = jnp.stack([src, dst])

    # Dense normalized adjacency (glue, not kernel): D^-0.5 (A_sym + I) D^-0.5
    A = jnp.zeros((N, N), jnp.float32).at[edge_idx[0], edge_idx[1]].set(1.0)
    A = jnp.maximum(A, A.T) + jnp.eye(N, dtype=jnp.float32)
    dinv = jax.lax.rsqrt(A.sum(axis=1))
    a_hat = dinv[:, None] * A * dinv[None, :]

    # Deterministic parameter init (shapes implied by the module's __init__):
    params = {
        "w_in":  jax.random.normal(ks[3], (nfeat, nhidden), jnp.float32) / math.sqrt(nfeat),
        "b_in":  0.01 * jax.random.normal(ks[4], (1, nhidden), jnp.float32),
        "w_conv": jax.random.normal(ks[5], (nlayer, nhidden, nhidden), jnp.float32)
                  / math.sqrt(nhidden),
        "gamma": jnp.ones((nlayer, nhidden), jnp.float32)
                 + 0.05 * jax.random.normal(ks[6], (nlayer, nhidden), jnp.float32),
        "beta":  0.05 * jax.random.normal(ks[7], (nlayer, nhidden), jnp.float32),
        "w_out": jax.random.normal(ks[8], (nhidden, nclass), jnp.float32) / math.sqrt(nhidden),
        "b_out": 0.01 * jax.random.normal(ks[9], (1, nclass), jnp.float32),
    }

    out = sandwitch_thr_forward(x, a_hat, params, nlayer, nhidden, nclass)
    out = jax.block_until_ready(out)

    prep = prepare_inputs(x, a_hat, params, nlayer, nhidden, nclass)
    ref = jax.block_until_ready(reference_forward(prep, nlayer, nclass))
    assert out.shape == (N, nclass)
    assert np.allclose(np.asarray(out), np.asarray(ref), atol=1e-2, rtol=1e-2), (
        float(np.max(np.abs(np.asarray(out) - np.asarray(ref)))))

    print("KERNEL_OK")
</pallas_src>

<mosaic_0001>
module attributes {stable_mosaic.version = 11 : i64} {
  func.func @lin_in_kernel(%arg0: memref<256x64xbf16, #tpu.memory_space<vmem>>, %arg1: memref<64x128xbf16, #tpu.memory_space<vmem>>, %arg2: memref<1x128xf32, #tpu.memory_space<vmem>>, %arg3: memref<1x128xf32, #tpu.memory_space<vmem>>, %arg4: memref<1x128xf32, #tpu.memory_space<vmem>>, %arg5: memref<256x128xbf16, #tpu.memory_space<vmem>>) attributes {dimension_semantics = [], scalar_prefetch = 0 : i64, scratch_operands = 0 : i64, tpu.core_type = #tpu.core_type<tc>} {
    %c0 = arith.constant 0 : index
    %c0_0 = arith.constant 0 : index
    %0 = vector.load %arg0[%c0, %c0_0] : memref<256x64xbf16, #tpu.memory_space<vmem>>, vector<256x64xbf16>
    %c0_1 = arith.constant 0 : index
    %c0_2 = arith.constant 0 : index
    %1 = vector.load %arg1[%c0_1, %c0_2] : memref<64x128xbf16, #tpu.memory_space<vmem>>, vector<64x128xbf16>
    %cst = arith.constant dense<0.000000e+00> : vector<256x128xf32>
    %2 = tpu.matmul %0, %1, %cst {dimension_numbers = #tpu.dot_dimension_numbers<[1], [0], [0], [1], [0, 0, 1, 1], [], []>} : vector<256x64xbf16>, vector<64x128xbf16>, vector<256x128xf32> -> vector<256x128xf32>
    %c0_3 = arith.constant 0 : index
    %c0_4 = arith.constant 0 : index
    %3 = vector.load %arg2[%c0_3, %c0_4] : memref<1x128xf32, #tpu.memory_space<vmem>>, vector<1x128xf32>
    %4 = vector.broadcast %3 : vector<1x128xf32> to vector<256x128xf32>
    %5 = arith.addf %2, %4 : vector<256x128xf32>
    %c0_5 = arith.constant 0 : index
    %c0_6 = arith.constant 0 : index
    %6 = vector.load %arg3[%c0_5, %c0_6] : memref<1x128xf32, #tpu.memory_space<vmem>>, vector<1x128xf32>
    %c0_7 = arith.constant 0 : index
    %c0_8 = arith.constant 0 : index
    %7 = vector.load %arg4[%c0_7, %c0_8] : memref<1x128xf32, #tpu.memory_space<vmem>>, vector<1x128xf32>
    %cst_9 = arith.constant dense<0.000000e+00> : vector<128xf32>
    %8 = vector.multi_reduction <add>, %5, %cst_9 [0] : vector<256x128xf32> to vector<128xf32>
    %9 = vector.shape_cast %8 : vector<128xf32> to vector<1x128xf32>
    %cst_10 = arith.constant 2.560000e+02 : f32
    %10 = vector.broadcast %cst_10 : f32 to vector<1x128xf32>
    %11 = arith.divf %9, %10 : vector<1x128xf32>
    %12 = arith.mulf %5, %5 : vector<256x128xf32>
    %cst_11 = arith.constant dense<0.000000e+00> : vector<128xf32>
    %13 = vector.multi_reduction <add>, %12, %cst_11 [0] : vector<256x128xf32> to vector<128xf32>
    %14 = vector.shape_cast %13 : vector<128xf32> to vector<1x128xf32>
    %cst_12 = arith.constant 2.560000e+02 : f32
    %15 = vector.broadcast %cst_12 : f32 to vector<1x128xf32>
    %16 = arith.divf %14, %15 : vector<1x128xf32>
    %17 = arith.mulf %11, %11 : vector<1x128xf32>
    %18 = arith.subf %16, %17 : vector<1x128xf32>
    %cst_13 = arith.constant 9.99999974E-6 : f32
    %19 = vector.broadcast %cst_13 : f32 to vector<1x128xf32>
    %20 = arith.addf %18, %19 : vector<1x128xf32>
    %21 = math.rsqrt %20 : vector<1x128xf32>
    %22 = arith.mulf %6, %21 : vector<1x128xf32>
    %23 = vector.broadcast %22 : vector<1x128xf32> to vector<256x128xf32>
    %24 = arith.mulf %5, %23 : vector<256x128xf32>
    %25 = arith.mulf %11, %22 : vector<1x128xf32>
    %26 = arith.subf %7, %25 : vector<1x128xf32>
    %27 = vector.broadcast %26 : vector<1x128xf32> to vector<256x128xf32>
    %28 = arith.addf %24, %27 : vector<256x128xf32>
    %cst_14 = arith.constant 0.000000e+00 : f32
    %29 = vector.broadcast %cst_14 : f32 to vector<256x128xf32>
    %30 = arith.maximumf %28, %29 : vector<256x128xf32>
    %31 = arith.truncf %30 : vector<256x128xf32> to vector<256x128xbf16>
    %c0_15 = arith.constant 0 : index
    %c0_16 = arith.constant 0 : index
    %32 = vector.load %arg5[%c0_15, %c0_16] : memref<256x128xbf16, #tpu.memory_space<vmem>>, vector<256x128xbf16>
    tpu.vector_store %arg5[%c0_15, %c0_16], %31 {strides = array<i32>} : memref<256x128xbf16, #tpu.memory_space<vmem>>, vector<256x128xbf16>,
    return
  }
}

</mosaic_0001>

<bundles_post_ra>
// kernel: tpu_custom_call.1
= control target key start
LH: loop header
LB: loop body
LE: loop exit
PB: predicated region body
PF: predicated region fallthrough
CT: control target
= control target key end

     0   :  { %s1277_s0 = inlined_call_operand.vmem [shape: bf16[256,64], index: 0, kind: input, shape index: {}]   ;;  %s1278_s1 = inlined_call_operand.vmem [shape: bf16[64,128], index: 1, kind: input, shape index: {}]   ;;  %s1279_s2 = inlined_call_operand.vmem [shape: f32[1,128], index: 2, kind: input, shape index: {}]   ;;  %s1280_s3 = inlined_call_operand.vmem [shape: f32[1,128], index: 3, kind: input, shape index: {}]   ;;  %s1281_s4 = inlined_call_operand.vmem [shape: f32[1,128], index: 4, kind: input, shape index: {}]   ;;  %s1282_s5 = inlined_call_operand.hbm [shape: bf16[256,128], index: 5, kind: output, shape index: {}]  }
   0x1   :  { %v740_v0 = vld [vmem:[%s1278_s1 + $0x18] sm:$0xff]  ;;  %v739_v1 = vld [vmem:[%s1278_s1 + $0x10] sm:$0xff] }
   0x2   :  { %223 = vmatpush.bf16.msra.mxu0 %v740_v0  ;;  %836 = vmatpush.bf16.msra.mxu1 %v740_v0 }
   0x3   :  { %837 = vmatpush.bf16.msra.mxu2 %v740_v0  ;;  %838 = vmatpush.bf16.msra.mxu3 %v740_v0 }
   0x4   :  { %10 = vsyncpa [#allocation3], 0  ;;  %v738_v2 = vld [vmem:[%s1278_s1 + $0x8] sm:$0xff]  ;;  %v737_v3 = vld [vmem:[%s1278_s1] sm:$0xff]  ;;  %vm170_vm0 = vcmask 523264   ;;  %s613_s12 = sshll.u32 %s1282_s5, 4  ;;  %s614_s12 = int_to_ptr.hbm [resolvable:$true] %s613_s12 }
   0x5   :  { %v721_v4 = vld [vmem:[%s1277_s0] sm:$0xff]  ;;  %v722_v8 = vld [vmem:[%s1277_s0 + $0x8] sm:$0xff]  ;;  %v723_v12 = vld [vmem:[%s1277_s0 + $0x10] sm:$0xff]  ;;  %s885_s13 = smov 64   ;;  %s886_s14 = smov 4  }
   0x6   :  { %224 = vmatpush.bf16.msra.mxu0 %v739_v1  ;;  %839 = vmatpush.bf16.msra.mxu1 %v739_v1  ;;  %v725_v5 = vld [vmem:[%s1277_s0 + $0x20] sm:$0xff]  ;;  %v726_v9 = vld [vmem:[%s1277_s0 + $0x28] sm:$0xff]  ;;  %v727_v13 = vld [vmem:[%s1277_s0 + $0x30] sm:$0xff] }
   0x7   :  { %840 = vmatpush.bf16.msra.mxu2 %v739_v1  ;;  %841 = vmatpush.bf16.msra.mxu3 %v739_v1  ;;  %v729_v6 = vld [vmem:[%s1277_s0 + $0x40] sm:$0xff]  ;;  %v730_v10 = vld [vmem:[%s1277_s0 + $0x48] sm:$0xff]  ;;  %v731_v14 = vld [vmem:[%s1277_s0 + $0x50] sm:$0xff] }
   0x8   :  { %v733_v7 = vld [vmem:[%s1277_s0 + $0x60] sm:$0xff]  ;;  %v734_v11 = vld [vmem:[%s1277_s0 + $0x68] sm:$0xff]  ;;  %v735_v15 = vld [vmem:[%s1277_s0 + $0x70] sm:$0xff] }
   0x9   :  { %v724_v16 = vld [vmem:[%s1277_s0 + $0x18] sm:$0xff]  ;;  %v1004_v34 = vld [vmem:[%s1279_s2] ss:$0 sm:$0xff] }
   0xa   :  { %225 = vmatpush.bf16.msra.mxu0 %v738_v2  ;;  %842 = vmatpush.bf16.msra.mxu1 %v738_v2  ;;  %v728_v17 = vld [vmem:[%s1277_s0 + $0x38] sm:$0xff] }
   0xb   :  { %843 = vmatpush.bf16.msra.mxu2 %v738_v2  ;;  %844 = vmatpush.bf16.msra.mxu3 %v738_v2  ;;  %v732_v18 = vld [vmem:[%s1277_s0 + $0x58] sm:$0xff] }
   0xc   :  { %v736_v19 = vld [vmem:[%s1277_s0 + $0x78] sm:$0xff] }
   0xe   :  { %226 = vmatpush.bf16.msra.mxu0 %v737_v3  ;;  %845 = vmatpush.bf16.msra.mxu1 %v737_v3 }
   0xf   :  { %846 = vmatpush.bf16.msra.mxu2 %v737_v3  ;;  %847 = vmatpush.bf16.msra.mxu3 %v737_v3 }
  0x11   :  { %705 = vmatmul.msk.bf16.vlgmr.msra.gmra.mxu0 %vm170_vm0, %v721_v4  ;;  %709 = vmatmul.msk.bf16.vlgmr.msra.gmra.mxu1 %vm170_vm0, %v725_v5 }
  0x12   :  { %713 = vmatmul.msk.bf16.vlgmr.msra.gmra.mxu2 %vm170_vm0, %v729_v6  ;;  %717 = vmatmul.msk.bf16.vlgmr.msra.gmra.mxu3 %vm170_vm0, %v733_v7 }
  0x21   :  { %706 = vmatmul.msk.bf16.gmra.mxu0 %vm170_vm0, %v722_v8  ;;  %710 = vmatmul.msk.bf16.gmra.mxu1 %vm170_vm0, %v726_v9 }
  0x22   :  { %714 = vmatmul.msk.bf16.gmra.mxu2 %vm170_vm0, %v730_v10  ;;  %718 = vmatmul.msk.bf16.gmra.mxu3 %vm170_vm0, %v734_v11 }
  0x31   :  { %707 = vmatmul.msk.bf16.gmra.mxu0 %vm170_vm0, %v723_v12  ;;  %711 = vmatmul.msk.bf16.gmra.mxu1 %vm170_vm0, %v727_v13 }
  0x32   :  { %715 = vmatmul.msk.bf16.gmra.mxu2 %vm170_vm0, %v731_v14  ;;  %719 = vmatmul.msk.bf16.gmra.mxu3 %vm170_vm0, %v735_v15 }
  0x41   :  { %708 = vmatmul.msk.bf16.gmra.mxu0 %vm170_vm0, %v724_v16  ;;  %712 = vmatmul.msk.bf16.gmra.mxu1 %vm170_vm0, %v728_v17 }
  0x42   :  { %716 = vmatmul.msk.bf16.gmra.mxu2 %vm170_vm0, %v732_v18  ;;  %720 = vmatmul.msk.bf16.gmra.mxu3 %vm170_vm0, %v736_v19 }
  0x8e   :  { %v228_v20 = vpop.f32.mrf.mxu0  ;;  %v248_v21 = vpop.f32.mrf.mxu1 }
  0x8f   :  { %v1012_v38 = vadd.f32 %v1004_v34, %v228_v20  ;;  %v1054_v2 = vadd.f32 %v1004_v34, %v248_v21 }
  0x91   :  { %v355_v43 = vmul.f32 %v1012_v38, %v1012_v38  ;;  %v363_v12 = vmul.f32 %v1054_v2, %v1054_v2 }
  0x95   :  { %v993_v24 = vpop.f32.mrf.mxu2  ;;  %v997_v30 = vpop.f32.mrf.mxu3 }
  0x96   :  { %v230_v22 = vpop.f32.mrf.mxu0  ;;  %v250_v23 = vpop.f32.mrf.mxu1 }
  0x97   :  { %v1009_v37 = vadd.f32 %v1004_v34, %v230_v22  ;;  %v1061_v7 = vadd.f32 %v1004_v34, %v250_v23 }
  0x99   :  { %v356_v41 = vmul.f32 %v1009_v37, %v1009_v37  ;;  %v310_v44 = vadd.f32 %v1009_v37, %v1012_v38  ;;  %v364_v16 = vmul.f32 %v1061_v7, %v1061_v7 }
  0x9b   :  { %v387_v49 = vadd.f32 %v356_v41, %v355_v43 }
  0x9d   :  { %v995_v28 = vpop.f32.mrf.mxu2  ;;  %v1006_v36 = vpop.f32.mrf.mxu3 }
  0x9e   :  { %v233_v25 = vpop.f32.mrf.mxu0  ;;  %v253_v26 = vpop.f32.mrf.mxu1 }
  0x9f   :  { %v1015_v39 = vadd.f32 %v1004_v34, %v233_v25  ;;  %v1071_v13 = vadd.f32 %v1004_v34, %v253_v26 }
  0xa1   :  { %v357_v45 = vmul.f32 %v1015_v39, %v1015_v39  ;;  %v311_v50 = vadd.f32 %v310_v44, %v1015_v39  ;;  %v365_v21 = vmul.f32 %v1071_v13, %v1071_v13 }
  0xa3   :  { %v388_v54 = vadd.f32 %v387_v49, %v357_v45 }
  0xa5   :  { %v999_v32 = vpop.f32.mrf.mxu2  ;;  %v1039_v53 = vpop.f32.mrf.mxu3 }
  0xa6   :  { %v235_v27 = vpop.f32.mrf.mxu0  ;;  %v255_v29 = vpop.f32.mrf.mxu1 }
  0xa7   :  { %v1022_v42 = vadd.f32 %v1004_v34, %v235_v27  ;;  %v1077_v17 = vadd.f32 %v1004_v34, %v255_v29 }
  0xa9   :  { %v358_v51 = vmul.f32 %v1022_v42, %v1022_v42  ;;  %v312_v55 = vadd.f32 %v311_v50, %v1022_v42  ;;  %v366_v26 = vmul.f32 %v1077_v17, %v1077_v17 }
  0xab   :  { %v389_v58 = vadd.f32 %v388_v54, %v358_v51  ;;  %v1106_v51 = vadd.f32 %v1004_v34, %v993_v24 }
  0xad   :  { %v1017_v40 = vpop.f32.mrf.mxu2  ;;  %v1066_v11 = vpop.f32.mrf.mxu3  ;;  %v371_v24 = vmul.f32 %v1106_v51, %v1106_v51 }
  0xae   :  { %v238_v31 = vpop.f32.mrf.mxu0  ;;  %v258_v33 = vpop.f32.mrf.mxu1 }
  0xaf   :  { %v1031_v46 = vadd.f32 %v1004_v34, %v238_v31  ;;  %v1083_v22 = vadd.f32 %v1004_v34, %v258_v33 }
  0xb1   :  { %v359_v56 = vmul.f32 %v1031_v46, %v1031_v46  ;;  %v313_v59 = vadd.f32 %v312_v55, %v1031_v46  ;;  %v367_v41 = vmul.f32 %v1083_v22, %v1083_v22 }
  0xb3   :  { %v390_v62 = vadd.f32 %v389_v58, %v359_v56 }
  0xb5   :  { %v278_v61 = vpop.f32.mrf.mxu2  ;;  %v298_v45 = vpop.f32.mrf.mxu3 }
  0xb6   :  { %v240_v35 = vpop.f32.mrf.mxu0  ;;  %v260_v48 = vpop.f32.mrf.mxu1 }
  0xb7   :  { %v1037_v52 = vadd.f32 %v1004_v34, %v240_v35  ;;  %v1089_v27 = vadd.f32 %v1004_v34, %v260_v48 }
  0xb9   :  { %v360_v60 = vmul.f32 %v1037_v52, %v1037_v52  ;;  %v314_v63 = vadd.f32 %v313_v59, %v1037_v52  ;;  %v1113_v59 = vadd.f32 %v1004_v34, %v995_v28 }
  0xbb   :  { %v391_v3 = vadd.f32 %v390_v62, %v360_v60  ;;  %v372_v28 = vmul.f32 %v1113_v59, %v1113_v59 }
  0xbd   :  { %v280_v20 = vpop.f32.mrf.mxu2 }
  0xbe   :  { %v243_v47 = vpop.f32.mrf.mxu0  ;;  %v263_v6 = vpop.f32.mrf.mxu1 }
  0xbf   :  { %v1045_v57 = vadd.f32 %v1004_v34, %v243_v47  ;;  %v1095_v43 = vadd.f32 %v1004_v34, %v263_v6  ;;  %v368_v47 = vmul.f32 %v1089_v27, %v1089_v27 }
  0xc1   :  { %v361_v0 = vmul.f32 %v1045_v57, %v1045_v57  ;;  %v315_v4 = vadd.f32 %v314_v63, %v1045_v57  ;;  %v369_v55 = vmul.f32 %v1095_v43, %v1095_v43 }
  0xc3   :  { %v392_v8 = vadd.f32 %v391_v3, %v361_v0  ;;  %v1122_v0 = vadd.f32 %v1004_v34, %v999_v32  ;;  %v1135_v32 = vadd.f32 %v1004_v34, %v278_v61 }
  0xc5   :  { %v283_v58 = vpop.f32.mrf.mxu2 }
  0xc6   :  { %v245_v1 = vpop.f32.mrf.mxu0  ;;  %v265_v35 = vpop.f32.mrf.mxu1 }
  0xc7   :  { %v1058_v5 = vadd.f32 %v1004_v34, %v245_v1  ;;  %v1102_v50 = vadd.f32 %v1004_v34, %v265_v35  ;;  %v1158_v35 = vadd.f32 %v1004_v34, %v997_v30 }
  0xc9   :  { %v316_v9 = vadd.f32 %v315_v4, %v1058_v5  ;;  %v362_v10 = vmul.f32 %v1058_v5, %v1058_v5  ;;  %v370_v63 = vmul.f32 %v1102_v50, %v1102_v50  ;;  %v1129_v4 = vadd.f32 %v1004_v34, %v1017_v40 }
  0xca   :  { %v379_v30 = vmul.f32 %v1158_v35, %v1158_v35 }
  0xcb   :  { %v317_v14 = vadd.f32 %v316_v9, %v1054_v2  ;;  %v393_v15 = vadd.f32 %v392_v8, %v362_v10  ;;  %v300_v9 = vpop.f32.mrf.mxu3  ;;  %v373_v10 = vmul.f32 %v1122_v0, %v1122_v0 }
  0xcd   :  { %v318_v18 = vadd.f32 %v317_v14, %v1061_v7  ;;  %v394_v19 = vadd.f32 %v393_v15, %v363_v12  ;;  %v374_v15 = vmul.f32 %v1129_v4, %v1129_v4 }
  0xcf   :  { %v319_v23 = vadd.f32 %v318_v18, %v1071_v13  ;;  %v395_v25 = vadd.f32 %v394_v19, %v364_v16  ;;  %v1141_v16 = vadd.f32 %v1004_v34, %v280_v20  ;;  %v285_v19 = vpop.f32.mrf.mxu2 }
  0xd1   :  { %v396_v29 = vadd.f32 %v395_v25, %v365_v21  ;;  %v320_v31 = vadd.f32 %v319_v23, %v1077_v17  ;;  %v375_v21 = vmul.f32 %v1135_v32, %v1135_v32  ;;  %v1148_v25 = vadd.f32 %v1004_v34, %v283_v58 }
  0xd3   :  { %v321_v33 = vadd.f32 %v320_v31, %v1083_v22  ;;  %v397_v44 = vadd.f32 %v396_v29, %v366_v26  ;;  %v376_v29 = vmul.f32 %v1141_v16, %v1141_v16  ;;  %v1154_v31 = vadd.f32 %v1004_v34, %v285_v19 }
  0xd5   :  { %v322_v48 = vadd.f32 %v321_v33, %v1089_v27  ;;  %v398_v49 = vadd.f32 %v397_v44, %v367_v41  ;;  %v377_v44 = vmul.f32 %v1148_v25, %v1148_v25 }
  0xd7   :  { %v323_v54 = vadd.f32 %v322_v48, %v1095_v43  ;;  %v399_v56 = vadd.f32 %v398_v49, %v368_v47  ;;  %v303_v47 = vpop.f32.mrf.mxu3  ;;  %v1165_v48 = vadd.f32 %v1004_v34, %v1006_v36 }
  0xd8   :  { %v304_v19 = vadd.f32 %v1004_v34, %v303_v47 }
  0xd9   :  { %v400_v60 = vadd.f32 %v399_v56, %v369_v55  ;;  %v324_v62 = vadd.f32 %v323_v54, %v1102_v50  ;;  %v378_v55 = vmul.f32 %v1154_v31, %v1154_v31  ;;  %v1174_v56 = vadd.f32 %v1004_v34, %v1039_v53 }
  0xda   :  { %v380_v36 = vmul.f32 %v1165_v48, %v1165_v48  ;;  %v1187_v53 = vadd.f32 %v1004_v34, %v298_v45 }
  0xdb   :  { %v325_v1 = vadd.f32 %v324_v62, %v1106_v51  ;;  %v401_v3 = vadd.f32 %v400_v60, %v370_v63  ;;  %v883_v62 = vmov 256.0   ;;  %v1181_v63 = vadd.f32 %v1004_v34, %v1066_v11 }
  0xdc   :  { %853 = vrcp.f32 %v883_v62 }
  0xdd   :  { %v326_v6 = vadd.f32 %v325_v1, %v1113_v59  ;;  %v402_v8 = vadd.f32 %v401_v3, %v371_v24  ;;  %v381_v3 = vmul.f32 %v1174_v56, %v1174_v56 }
  0xdf   :  { %v403_v12 = vadd.f32 %v402_v8, %v372_v28  ;;  %v327_v14 = vadd.f32 %v326_v6, %v1122_v0 }
  0xe1   :  { %v328_v40 = vadd.f32 %v327_v14, %v1129_v4  ;;  %v404_v18 = vadd.f32 %v403_v12, %v373_v10  ;;  %v382_v10 = vmul.f32 %v1181_v63, %v1181_v63  ;;  %v1193_v12 = vadd.f32 %v1004_v34, %v300_v9 }
  0xe2   :  { %v854_v8 = vpop.eup %853 }
  0xe3   :  { %v329_v23 = vadd.f32 %v328_v40, %v1135_v32  ;;  %v405_v61 = vadd.f32 %v404_v18, %v374_v15  ;;  %v305_v15 = vpop.f32.mrf.mxu3  ;;  %v383_v40 = vmul.f32 %v1187_v53, %v1187_v53  ;;  %vm352_vm1 = vweird.f32 %v854_v8 }
  0xe5   :  { %v330_v26 = vadd.f32 %v329_v23, %v1141_v16  ;;  %v406_v20 = vadd.f32 %v405_v61, %v375_v21  ;;  %v348_v21 = vmul.f32 256.0, %v854_v8  ;;  %v384_v61 = vmul.f32 %v1193_v12, %v1193_v12 }
  0xe7   :  { %v407_v41 = vadd.f32 %v406_v20, %v376_v29  ;;  %v331_v33 = vadd.f32 %v330_v26, %v1148_v25  ;;  %v306_v26 = vadd.f32 %v1004_v34, %v305_v15 }
  0xe9   :  { %v408_v49 = vadd.f32 %v407_v41, %v377_v44  ;;  %v332_v54 = vadd.f32 %v331_v33, %v1154_v31  ;;  %v385_v41 = vmul.f32 %v304_v19, %v304_v19  ;;  %v349_v33 = vsub.f32 1.0, %v348_v21 }
  0xeb   :  { %v333_v58 = vadd.f32 %v332_v54, %v1158_v35  ;;  %v409_v60 = vadd.f32 %v408_v49, %v378_v55  ;;  %v386_v54 = vmul.f32 %v306_v26, %v306_v26 }
  0xed   :  { %v334_v24 = vadd.f32 %v333_v58, %v1165_v48  ;;  %v410_v1 = vadd.f32 %v409_v60, %v379_v30  ;;  %v350_v58 = vmul.f32 %v854_v8, %v349_v33 }
  0xef   :  { %v411_v28 = vadd.f32 %v410_v1, %v380_v36  ;;  %v335_v6 = vadd.f32 %v334_v24, %v1174_v56  ;;  %v351_v24 = vadd.f32 %v854_v8, %v350_v58 }
  0xf1   :  { %v336_v11 = vadd.f32 %v335_v6, %v1181_v63  ;;  %v412_v14 = vadd.f32 %v411_v28, %v381_v3  ;;  %v353_v6 = vsel %vm352_vm1, %v854_v8, %v351_v24 }
  0xf3   :  { %v337_v45 = vadd.f32 %v336_v11, %v1187_v53  ;;  %v413_v18 = vadd.f32 %v412_v14, %v382_v10 }
  0xf5   :  { %v338_v23 = vadd.f32 %v337_v45, %v1193_v12  ;;  %v414_v9 = vadd.f32 %v413_v18, %v383_v40 }
  0xf7   :  { %v415_v29 = vadd.f32 %v414_v9, %v384_v61  ;;  %v339_v20 = vadd.f32 %v338_v23, %v304_v19 }
  0xf9   :  { %v416_v44 = vadd.f32 %v415_v29, %v385_v41  ;;  %v340_v49 = vadd.f32 %v339_v20, %v306_v26  ;;  %v308_v41 = vld [vmem:[%s1280_s3] sm:$0x1]  ;;  %s884_s3 = smov [#allocation2]  }
  0xfb   :  { %v341_v55 = vrot.slane %v340_v49, 4  ;;  %v417_v30 = vadd.f32 %v416_v44, %v386_v54 }
  0xfd   :  { %v342_v47 = vadd.f32 %v341_v55, %v340_v49  ;;  %v418_v60 = vrot.slane %v417_v30, 4  ;;  %v309_v49 = vld [vmem:[%s1281_s4] sm:$0x1]  ;;  %s611_s4 = sshll.u32 %s884_s3, 4  ;;  %s612_s4 = int_to_ptr.vmem [resolvable:$true] %s611_s4 }
  0xff   :  { %v343_v62 = vrot.slane %v342_v47, 2  ;;  %v419_v36 = vadd.f32 %v418_v60, %v417_v30 }
 0x101   :  { %v344_v1 = vadd.f32 %v343_v62, %v342_v47  ;;  %v420_v3 = vrot.slane %v419_v36, 2 }
 0x103   :  { %v345_v28 = vrot.slane %v344_v1, 1  ;;  %v421_v34 = vadd.f32 %v420_v3, %v419_v36 }
 0x105   :  { %v346_v10 = vadd.f32 %v345_v28, %v344_v1  ;;  %v422_v11 = vrot.slane %v421_v34, 1 }
 0x107   :  { %v354_v14 = vmul.f32 %v353_v6, %v346_v10  ;;  %v423_v15 = vadd.f32 %v422_v11, %v421_v34 }
 0x109   :  { %v424_v40 = vmul.f32 %v423_v15, %v353_v6  ;;  %v425_v45 = vmul.f32 %v354_v14, %v354_v14 }
 0x10b   :  { %v426_v18 = vsub.f32 %v424_v40, %v425_v45 }
 0x10d   :  { %v427_v21 = vadd.f32 1e-05, %v426_v18 }
 0x10f   :  { %855 = vrsqrt.f32 %v427_v21  ;;  %vm434_vm3 = vweird.f32 %v427_v21 }
 0x115   :  { %v856_v23 = vpop.eup %855 }
 0x116   :  { %v429_v61 = vmul.f32 %v856_v23, %v427_v21  ;;  %vm435_vm2 = vweird.f32 %v856_v23 }
 0x117   :  { %vm436_vm4 = vmor %vm434_vm3, %vm435_vm2 }
 0x118   :  { %v430_v9 = vmul.f32 %v856_v23, %v429_v61 }
 0x11a   :  { %v431_v29 = vmul.f32 0.5, %v430_v9 }
 0x11c   :  { %v432_v20 = vsub.f32 1.5, %v431_v29 }
 0x11e   :  { %v433_v8 = vmul.f32 %v856_v23, %v432_v20 }
 0x120   :  { %v437_v33 = vsel %vm436_vm4, %v856_v23, %v433_v8 }
 0x121   :  { %v438_v44 = vmul.f32 %v437_v33, %v308_v41 }
 0x123   :  { %v440_v54 = vperm.slane %v438_v44, 0  ;;  %v474_v55 = vmul.f32 %v438_v44, %v354_v14 }
 0x125   :  { %v475_v30 = vsub.f32 %v309_v49, %v474_v55  ;;  %v472_v58 = vmul.f32 %v440_v54, %v304_v19  ;;  %v473_v47 = vmul.f32 %v440_v54, %v306_v26  ;;  %v442_v3 = vmul.f32 %v440_v54, %v1012_v38 }
 0x126   :  { %v443_v28 = vmul.f32 %v440_v54, %v1009_v37  ;;  %v444_v34 = vmul.f32 %v440_v54, %v1015_v39  ;;  %v445_v6 = vmul.f32 %v440_v54, %v1022_v42  ;;  %v446_v10 = vmul.f32 %v440_v54, %v1031_v46 }
 0x127   :  { %v1210_v60 = vperm.slane %v475_v30, 0  ;;  %v447_v19 = vmul.f32 %v440_v54, %v1037_v52  ;;  %v448_v11 = vmul.f32 %v440_v54, %v1045_v57  ;;  %v449_v14 = vmul.f32 %v440_v54, %v1058_v5 }
 0x128   :  { %v450_v15 = vmul.f32 %v440_v54, %v1054_v2  ;;  %v451_v40 = vmul.f32 %v440_v54, %v1061_v7  ;;  %v452_v38 = vmul.f32 %v440_v54, %v1071_v13  ;;  %v453_v37 = vmul.f32 %v440_v54, %v1077_v17 }
 0x129   :  { %v509_v62 = vadd.f32 %v1210_v60, %v472_v58  ;;  %v510_v36 = vadd.f32 %v1210_v60, %v473_v47  ;;  %v454_v39 = vmul.f32 %v440_v54, %v1083_v22  ;;  %v455_v42 = vmul.f32 %v440_v54, %v1089_v27 }
 0x12a   :  { %v456_v46 = vmul.f32 %v440_v54, %v1095_v43  ;;  %v457_v52 = vmul.f32 %v440_v54, %v1102_v50  ;;  %v458_v57 = vmul.f32 %v440_v54, %v1106_v51  ;;  %v459_v5 = vmul.f32 %v440_v54, %v1113_v59 }
 0x12b   :  { %v541_v24 = vmax.f32 %v509_v62, 0.0  ;;  %v542_v1 = vmax.f32 %v510_v36, 0.0  ;;  %v460_v2 = vmul.f32 %v440_v54, %v1122_v0  ;;  %v461_v7 = vmul.f32 %v440_v54, %v1129_v4 }
 0x12c   :  { %v462_v13 = vmul.f32 %v440_v54, %v1135_v32  ;;  %v463_v17 = vmul.f32 %v440_v54, %v1141_v16  ;;  %v464_v22 = vmul.f32 %v440_v54, %v1148_v25  ;;  %v465_v27 = vmul.f32 %v440_v54, %v1154_v31 }
 0x12d   :  { %v819_v26 = vpack.c.bf16 %v542_v1, %v541_v24  ;;  %v466_v43 = vmul.f32 %v440_v54, %v1158_v35  ;;  %v467_v50 = vmul.f32 %v440_v54, %v1165_v48  ;;  %v468_v51 = vmul.f32 %v440_v54, %v1174_v56 }
 0x12e   :  { %v469_v59 = vmul.f32 %v440_v54, %v1181_v63  ;;  %v470_v0 = vmul.f32 %v440_v54, %v1187_v53  ;;  %v471_v4 = vmul.f32 %v440_v54, %v1193_v12  ;;  %v479_v32 = vadd.f32 %v1210_v60, %v442_v3 }
 0x12f   :  { %835 = vst [vmem:[#allocation2 + $0x78] sm:$0xff] %v819_v26   ;;  %v480_v16 = vadd.f32 %v1210_v60, %v443_v28  ;;  %v481_v25 = vadd.f32 %v1210_v60, %v444_v34  ;;  %v482_v31 = vadd.f32 %v1210_v60, %v445_v6  ;;  %v483_v35 = vadd.f32 %v1210_v60, %v446_v10 }
 0x130   :  { %v484_v48 = vadd.f32 %v1210_v60, %v447_v19  ;;  %v485_v56 = vadd.f32 %v1210_v60, %v448_v11  ;;  %v486_v63 = vadd.f32 %v1210_v60, %v449_v14  ;;  %v487_v53 = vadd.f32 %v1210_v60, %v450_v15 }
 0x131   :  { %v488_v12 = vadd.f32 %v1210_v60, %v451_v40  ;;  %v489_v45 = vadd.f32 %v1210_v60, %v452_v38  ;;  %v490_v18 = vadd.f32 %v1210_v60, %v453_v37  ;;  %v491_v21 = vadd.f32 %v1210_v60, %v454_v39 }
 0x132   :  { %v492_v23 = vadd.f32 %v1210_v60, %v455_v42  ;;  %v493_v61 = vadd.f32 %v1210_v60, %v456_v46  ;;  %v494_v9 = vadd.f32 %v1210_v60, %v457_v52  ;;  %v495_v29 = vadd.f32 %v1210_v60, %v458_v57 }
 0x133   :  { %v496_v20 = vadd.f32 %v1210_v60, %v459_v5  ;;  %v497_v41 = vadd.f32 %v1210_v60, %v460_v2  ;;  %v498_v8 = vadd.f32 %v1210_v60, %v461_v7  ;;  %v499_v33 = vadd.f32 %v1210_v60, %v462_v13 }
 0x134   :  { %v500_v44 = vadd.f32 %v1210_v60, %v463_v17  ;;  %v501_v49 = vadd.f32 %v1210_v60, %v464_v22  ;;  %v511_v54 = vmax.f32 %v479_v32, 0.0  ;;  %v512_v55 = vmax.f32 %v480_v16, 0.0 }
 0x135   :  { %v513_v30 = vmax.f32 %v481_v25, 0.0  ;;  %v514_v58 = vmax.f32 %v482_v31, 0.0  ;;  %v515_v47 = vmax.f32 %v483_v35, 0.0  ;;  %v516_v62 = vmax.f32 %v484_v48, 0.0 }
 0x136   :  { %v517_v36 = vmax.f32 %v485_v56, 0.0  ;;  %v518_v24 = vmax.f32 %v486_v63, 0.0  ;;  %v502_v1 = vadd.f32 %v1210_v60, %v465_v27  ;;  %v503_v3 = vadd.f32 %v1210_v60, %v466_v43 }
 0x137   :  { %v519_v28 = vmax.f32 %v487_v53, 0.0  ;;  %v520_v34 = vmax.f32 %v488_v12, 0.0  ;;  %v504_v6 = vadd.f32 %v1210_v60, %v467_v50  ;;  %v505_v10 = vadd.f32 %v1210_v60, %v468_v51 }
 0x138   :  { %v521_v19 = vmax.f32 %v489_v45, 0.0  ;;  %v522_v26 = vmax.f32 %v490_v18, 0.0  ;;  %v523_v11 = vmax.f32 %v491_v21, 0.0  ;;  %v524_v14 = vmax.f32 %v492_v23, 0.0 }
 0x139   :  { %v525_v15 = vmax.f32 %v493_v61, 0.0  ;;  %v744_v40 = vpack.c.bf16 %v512_v55, %v511_v54  ;;  %v526_v38 = vmax.f32 %v494_v9, 0.0  ;;  %v749_v37 = vpack.c.bf16 %v514_v58, %v513_v30 }
 0x13a   :  { %v754_v39 = vpack.c.bf16 %v516_v62, %v515_v47  ;;  %v759_v42 = vpack.c.bf16 %v518_v24, %v517_v36  ;;  %v506_v46 = vadd.f32 %v1210_v60, %v469_v59  ;;  %v527_v52 = vmax.f32 %v495_v29, 0.0 }
 0x13b   :  { %v528_v57 = vmax.f32 %v496_v20, 0.0  ;;  %745 = vst [vmem:[#allocation2] sm:$0xff] %v744_v40   ;;  %v764_v5 = vpack.c.bf16 %v520_v34, %v519_v28  ;;  %v507_v2 = vadd.f32 %v1210_v60, %v470_v0  ;;  %v529_v7 = vmax.f32 %v497_v41, 0.0 }
 0x13c   :  { %v530_v13 = vmax.f32 %v498_v8, 0.0  ;;  %821 = vst [vmem:[#allocation2 + $0x8] sm:$0xff] %v749_v37   ;;  %v769_v17 = vpack.c.bf16 %v522_v26, %v521_v19  ;;  %v508_v22 = vadd.f32 %v1210_v60, %v471_v4  ;;  %v531_v27 = vmax.f32 %v499_v33, 0.0 }
 0x13d   :  { %v532_v43 = vmax.f32 %v500_v44, 0.0  ;;  %822 = vst [vmem:[#allocation2 + $0x10] sm:$0xff] %v754_v39   ;;  %v774_v50 = vpack.c.bf16 %v524_v14, %v523_v11  ;;  %v533_v51 = vmax.f32 %v501_v49, 0.0  ;;  %v534_v32 = vmax.f32 %v502_v1, 0.0 }
 0x13e   :  { %823 = vst [vmem:[#allocation2 + $0x18] sm:$0xff] %v759_v42   ;;  %v779_v59 = vpack.c.bf16 %v526_v38, %v525_v15  ;;  %v535_v16 = vmax.f32 %v503_v3, 0.0  ;;  %v536_v25 = vmax.f32 %v504_v6, 0.0  ;;  %v784_v31 = vpack.c.bf16 %v528_v57, %v527_v52 }
 0x13f   :  { %824 = vst [vmem:[#allocation2 + $0x20] sm:$0xff] %v764_v5   ;;  %v537_v35 = vmax.f32 %v505_v10, 0.0  ;;  %v538_v0 = vmax.f32 %v506_v46, 0.0  ;;  %v789_v48 = vpack.c.bf16 %v530_v13, %v529_v7  ;;  %v539_v56 = vmax.f32 %v507_v2, 0.0 }
 0x140   :  { %825 = vst [vmem:[#allocation2 + $0x28] sm:$0xff] %v769_v17   ;;  %v540_v63 = vmax.f32 %v508_v22, 0.0  ;;  %v794_v60 = vpack.c.bf16 %v532_v43, %v531_v27  ;;  %v799_v4 = vpack.c.bf16 %v534_v32, %v533_v51  ;;  %v804_v53 = vpack.c.bf16 %v536_v25, %v535_v16 }
 0x141   :  { %826 = vst [vmem:[#allocation2 + $0x30] sm:$0xff] %v774_v50   ;;  %v809_v12 = vpack.c.bf16 %v538_v0, %v537_v35 }
 0x142   :  { %827 = vst [vmem:[#allocation2 + $0x38] sm:$0xff] %v779_v59   ;;  %v814_v45 = vpack.c.bf16 %v540_v63, %v539_v56 }
 0x143   :  { %828 = vst [vmem:[#allocation2 + $0x40] sm:$0xff] %v784_v31  }
 0x144   :  { %829 = vst [vmem:[#allocation2 + $0x48] sm:$0xff] %v789_v48  }
 0x145   :  { %830 = vst [vmem:[#allocation2 + $0x50] sm:$0xff] %v794_v60  }
 0x146   :  { %831 = vst [vmem:[#allocation2 + $0x58] sm:$0xff] %v799_v4  }
 0x147   :  { %832 = vst [vmem:[#allocation2 + $0x60] sm:$0xff] %v804_v53  }
 0x148   :  { %833 = vst [vmem:[#allocation2 + $0x68] sm:$0xff] %v809_v12  }
 0x149   :  { %834 = vst [vmem:[#allocation2 + $0x70] sm:$0xff] %v814_v45  }
 0x14a   :  { %619 = dma.vmem_to_hbm [thread:$0]  %s612_s4, 2048, %s614_s12, [#allocation3], %s885_s13, %s885_s13, %s886_s14  }
 0x14b   :  { %881 = dma.done.wait [#allocation3], 2048  }
 0x14c   :  { %882 = vsyncadd [#allocation3], 4294965248 }
 0x14d   :  { %624 = vsyncpa [#allocation3], 1 }

</bundles_post_ra>
